<compile_context>
chip_gen: v7x
topology: tpu7x:2x2x1
jax: 0.10.0
libtpu: 0.0.40
codegen_flags: <defaults>
</compile_context>

<pallas_src>
import jax
import jax.numpy as jnp
from jax.experimental import pallas as pl
from jax.experimental.pallas import tpu as pltpu


# ---------------------------------------------------------------------------
# Fused kernel: y = sum_c w[c] * x[c, :] + b ; attn = sigmoid(y)
#   x_ref : (C, ts)  VMEM   (spatial tile on lanes)
#   w_ref : (C, 1)   VMEM
#   b_ref : (1,)     SMEM   (scalar bias)
#   y_ref, attn_ref : (1, ts) VMEM outputs (lane-dense)
# ---------------------------------------------------------------------------
def predict_kernel(x_ref, w_ref, b_ref, y_ref, attn_ref):
    x = x_ref[...]                                   # (C, ts)
    w = w_ref[...]                                   # (C, 1) broadcast over lanes
    y = jnp.sum(x * w, axis=0, keepdims=True)        # (1, ts)
    y = y + b_ref[0]
    y_ref[...] = y
    attn_ref[...] = 1.0 / (1.0 + jnp.exp(-y))        # sigmoid


def _pick_spatial_tile(S, ts_max=8192):
    """Largest spatial tile: full S if small, else a 128-multiple divisor of S."""
    if S <= ts_max:
        return S
    t = (ts_max // 128) * 128
    while t >= 128:
        if S % t == 0:
            return t
        t -= 128
    return S  # fallback: whole spatial extent as one block


def predict_forward(x, w, b, *, ts_max=8192):
    """Forward pass of `Predict` for NCHW float32 input x.

    x: (N, C, H, W), w: (1, C, 1, 1), b: (1,)
    Returns (conv_out, sigmoid(conv_out)), both (N, 1, H, W).
    """
    N, C, H, W = x.shape
    Cout = w.shape[0]
    assert Cout == 1, "Predict head has a single output channel"
    S = H * W

    # Pure views, no transposes / copies: stay in NCHW.
    x_r = x.reshape(N, C, S)          # (N, C, S)
    w_col = w.reshape(C, 1)           # (C, 1)

    ts = _pick_spatial_tile(S, ts_max)
    grid = (N, S // ts)

    y_flat, attn_flat = pl.pallas_call(
        predict_kernel,
        out_shape=(
            jax.ShapeDtypeStruct((N, 1, S), jnp.float32),
            jax.ShapeDtypeStruct((N, 1, S), jnp.float32),
        ),
        grid_spec=pltpu.PrefetchScalarGridSpec(
            num_scalar_prefetch=0,
            grid=grid,
            in_specs=[
                # batch dim squeezed; kernel sees (C, ts)
                pl.BlockSpec((pl.Squeezed(), C, ts), lambda n, j: (n, 0, j)),
                # full (C, 1) weight, resident across the grid
                pl.BlockSpec((C, 1), lambda n, j: (0, 0)),
                # scalar bias in SMEM
                pl.BlockSpec(memory_space=pltpu.MemorySpace.SMEM),
            ],
            out_specs=(
                pl.BlockSpec((pl.Squeezed(), 1, ts), lambda n, j: (n, 0, j)),
                pl.BlockSpec((pl.Squeezed(), 1, ts), lambda n, j: (n, 0, j)),
            ),
        ),
        compiler_params=pltpu.CompilerParams(
            dimension_semantics=("parallel", "parallel"),
        ),
    )(x_r, w_col, b)

    return (
        y_flat.reshape(N, 1, H, W),
        attn_flat.reshape(N, 1, H, W),
    )


# ---------------------------------------------------------------------------
# Pure-JAX reference (mirrors the PyTorch forward) for verification.
# ---------------------------------------------------------------------------
def predict_reference(x, w, b):
    Cout, C = w.shape[0], w.shape[1]
    y = jnp.einsum("nchw,oc->nohw", x, w.reshape(Cout, C)) + b[None, :, None, None]
    attn = 1.0 / (1.0 + jnp.exp(-y))
    return y, attn


if __name__ == "__main__":
    key = jax.random.PRNGKey(0)
    k1, k2, k3 = jax.random.split(key, 3)

    # Small shapes consistent with the module: Predict(in_ch=32), batch=2,
    # spatial 16x16.
    N, C, H, W = 2, 32, 16, 16
    x = jax.random.normal(k1, (N, C, H, W), dtype=jnp.float32)
    # Conv2d(C, 1, kernel_size=1) weight / bias.
    w = 0.1 * jax.random.normal(k2, (1, C, 1, 1), dtype=jnp.float32)
    b = 0.1 * jax.random.normal(k3, (1,), dtype=jnp.float32)

    y, attn = predict_forward(x, w, b)
    jax.block_until_ready((y, attn))

    y_ref, attn_ref = predict_reference(x, w, b)
    assert y.shape == (N, 1, H, W), y.shape
    assert attn.shape == (N, 1, H, W), attn.shape
    assert jnp.allclose(y, y_ref, atol=1e-5, rtol=1e-5), float(
        jnp.max(jnp.abs(y - y_ref))
    )
    assert jnp.allclose(attn, attn_ref, atol=1e-5, rtol=1e-5), float(
        jnp.max(jnp.abs(attn - attn_ref))
    )

    print("KERNEL_OK")
</pallas_src>

<mosaic_0001>
module attributes {stable_mosaic.version = 11 : i64} {
  func.func @predict_kernel(%arg0: i32, %arg1: i32, %arg2: memref<1x32x256xf32, #tpu.memory_space<vmem>>, %arg3: memref<32x1xf32, #tpu.memory_space<vmem>>, %arg4: memref<1xf32, #tpu.memory_space<smem>>, %arg5: memref<1x1x256xf32, #tpu.memory_space<vmem>>, %arg6: memref<1x1x256xf32, #tpu.memory_space<vmem>>) attributes {dimension_semantics = [#tpu.dimension_semantics<parallel>, #tpu.dimension_semantics<parallel>], iteration_bounds = array<i64: 2, 1>, scalar_prefetch = 0 : i64, scratch_operands = 0 : i64, tpu.core_type = #tpu.core_type<tc>, window_params = [{transform_indices = @transform_0, window_bounds = array<i64: 1, 32, 256>}, {pipeline_mode = #tpu.pipeline_mode<synchronous>, transform_indices = @transform_1, window_bounds = array<i64: 32, 1>}, {transform_indices = @transform_2, window_bounds = array<i64: 1>}, {transform_indices = @transform_3, window_bounds = array<i64: 1, 1, 256>}, {transform_indices = @transform_4, window_bounds = array<i64: 1, 1, 256>}]} {
    %c0 = arith.constant 0 : index
    %c0_0 = arith.constant 0 : index
    %c0_1 = arith.constant 0 : index
    %0 = vector.load %arg2[%c0, %c0_0, %c0_1] : memref<1x32x256xf32, #tpu.memory_space<vmem>>, vector<1x32x256xf32>
    %1 = vector.shape_cast %0 : vector<1x32x256xf32> to vector<32x256xf32>
    %c0_2 = arith.constant 0 : index
    %c0_3 = arith.constant 0 : index
    %2 = vector.load %arg3[%c0_2, %c0_3] : memref<32x1xf32, #tpu.memory_space<vmem>>, vector<32x1xf32>
    %3 = vector.broadcast %2 : vector<32x1xf32> to vector<32x256xf32>
    %4 = arith.mulf %1, %3 : vector<32x256xf32>
    %cst = arith.constant dense<0.000000e+00> : vector<256xf32>
    %5 = vector.multi_reduction <add>, %4, %cst [0] : vector<32x256xf32> to vector<256xf32>
    %6 = vector.shape_cast %5 : vector<256xf32> to vector<1x256xf32>
    %c0_4 = arith.constant 0 : index
    %7 = memref.load %arg4[%c0_4] : memref<1xf32, #tpu.memory_space<smem>>
    %8 = vector.broadcast %7 : f32 to vector<1x256xf32>
    %9 = arith.addf %6, %8 : vector<1x256xf32>
    %c0_5 = arith.constant 0 : index
    %c0_6 = arith.constant 0 : index
    %c0_7 = arith.constant 0 : index
    %10 = vector.load %arg5[%c0_5, %c0_6, %c0_7] : memref<1x1x256xf32, #tpu.memory_space<vmem>>, vector<1x1x256xf32>
    %11 = vector.shape_cast %10 : vector<1x1x256xf32> to vector<1x256xf32>
    %12 = vector.shape_cast %9 : vector<1x256xf32> to vector<1x1x256xf32>
    tpu.vector_store %arg5[%c0_5, %c0_6, %c0_7], %12 {strides = array<i32>} : memref<1x1x256xf32, #tpu.memory_space<vmem>>, vector<1x1x256xf32>,
    %cst_8 = arith.constant 0.000000e+00 : f32
    %13 = vector.broadcast %cst_8 : f32 to vector<1x256xf32>
    %14 = arith.subf %13, %9 : vector<1x256xf32>
    %15 = math.exp %14 : vector<1x256xf32>
    %cst_9 = arith.constant 1.000000e+00 : f32
    %16 = vector.broadcast %cst_9 : f32 to vector<1x256xf32>
    %17 = arith.addf %16, %15 : vector<1x256xf32>
    %cst_10 = arith.constant 1.000000e+00 : f32
    %18 = vector.broadcast %cst_10 : f32 to vector<1x256xf32>
    %19 = arith.divf %18, %17 : vector<1x256xf32>
    %c0_11 = arith.constant 0 : index
    %c0_12 = arith.constant 0 : index
    %c0_13 = arith.constant 0 : index
    %20 = vector.load %arg6[%c0_11, %c0_12, %c0_13] : memref<1x1x256xf32, #tpu.memory_space<vmem>>, vector<1x1x256xf32>
    %21 = vector.shape_cast %20 : vector<1x1x256xf32> to vector<1x256xf32>
    %22 = vector.shape_cast %19 : vector<1x256xf32> to vector<1x1x256xf32>
    tpu.vector_store %arg6[%c0_11, %c0_12, %c0_13], %22 {strides = array<i32>} : memref<1x1x256xf32, #tpu.memory_space<vmem>>, vector<1x1x256xf32>,
    return
  }
  func.func @transform_0(%arg0: i32, %arg1: i32) -> (i32, i32, i32) {
    %c0_i32 = arith.constant 0 : i32
    %c0_i32_0 = arith.constant 0 : i32
    return %arg0, %c0_i32, %arg1 : i32, i32, i32
  }
  func.func @transform_1(%arg0: i32, %arg1: i32) -> (i32, i32) {
    %c0_i32 = arith.constant 0 : i32
    %c0_i32_0 = arith.constant 0 : i32
    %c0_i32_1 = arith.constant 0 : i32
    return %c0_i32, %c0_i32_0 : i32, i32
  }
  func.func @transform_2(%arg0: i32, %arg1: i32) -> i32 {
    %c0_i32 = arith.constant 0 : i32
    %c0_i32_0 = arith.constant 0 : i32
    return %c0_i32 : i32
  }
  func.func @transform_3(%arg0: i32, %arg1: i32) -> (i32, i32, i32) {
    %c0_i32 = arith.constant 0 : i32
    %c0_i32_0 = arith.constant 0 : i32
    return %arg0, %c0_i32, %arg1 : i32, i32, i32
  }
  func.func @transform_4(%arg0: i32, %arg1: i32) -> (i32, i32, i32) {
    %c0_i32 = arith.constant 0 : i32
    %c0_i32_0 = arith.constant 0 : i32
    return %arg0, %c0_i32, %arg1 : i32, i32, i32
  }
}

</mosaic_0001>

<bundles_post_ra>
// kernel: tpu_custom_call.1
= control target key start
LH: loop header
LB: loop body
LE: loop exit
PB: predicated region body
PF: predicated region fallthrough
CT: control target
= control target key end

     0   :  { %s1039_s0 = inlined_call_operand.hbm [shape: f32[2,32,256], index: 0, kind: input, shape index: {}]   ;;  %s1040_s1 = inlined_call_operand.vmem [shape: f32[32,1], index: 1, kind: input, shape index: {}]   ;;  %s1041_s2 = inlined_call_operand.<no memory space> [shape: f32[1], index: 2, kind: input, shape index: {}]   ;;  %s1042_s3 = inlined_call_operand.hbm [shape: f32[2,1,256], index: 3, kind: output, shape index: {0}]   ;;  %s1043_s4 = inlined_call_operand.hbm [shape: f32[2,1,256], index: 4, kind: output, shape index: {1}]  }
   0x1   :  { %10 = sst [smem:[#allocation2]] %s1041_s2 }
   0x2   :  { %11 = vsyncpa [#allocation4], 0 }
   0x3   :  { %13 = vsyncpa [#allocation4 + $0x1], 0 }
   0x4   :  { %14 = vsyncpa [#allocation5], 0 }
   0x5   :  { %16 = vsyncpa [#allocation5 + $0x1], 0 }
   0x6   :  { %17 = vsyncpa [#allocation8], 0 }
   0x7   :  { %19 = vsyncpa [#allocation8 + $0x1], 0  ;;  %s808_s17 = smov 0   ;;  %s810_s18 = smov 0  }
   0x8   :  { %s812_s19 = smov 0   ;;  %s814_s20 = smov 0  }
   0x9   :  { %s816_s21 = smov 0   ;;  %s818_s22 = smov 0  }
   0xa LB: > { %s524_s2 = sadd.s32 4294967295, %s771_s22   ;;  %s525_s23 = sadd.s32 4294967294, %s771_s22   ;;  %s771_s22 = sphi %s818_s22, %s25_s22   ;;  %s767_s21 = sphi %s816_s21, %s1060_s21   ;;  %s763_s20 = sphi %s814_s20, %s1059_s20   ;;  %s759_s19 = sphi %s812_s19, %s1058_s19   ;;  %s755_s18 = sphi %s810_s18, %s1057_s18   ;;  %s751_s17 = sphi %s808_s17, %s1056_s17  }
   0xb   : > { %s37_s24 = sadd.s32 1, %s767_s21  ;;  %s46_s25 = sadd.s32 1, %s759_s19 }
   0xc   : > { %p39_p0 = scmp.ge.s32.totalorder %s37_s24, 2  ;;  %p53_p1 = scmp.ne.s32.totalorder %s759_s19, %s755_s18 }
   0xd   : > { %p54_p2 = scmp.eq.s32.totalorder %s771_s22, 0  ;;  %p59_p3 = scmp.ne.s32.totalorder %s755_s18, %s751_s17 }
   0xe   : > { %s1062_s24 = smov (%p39_p0, %s37_s24), 0  ;;  %p60_p5 = scmp.eq.s32.totalorder %s524_s2, 0 }
   0xf   : > { %p849_p4 = por %p54_p2, %p53_p1  ;;  %s41_s27 = ssub.s32 %s767_s21, %s1062_s24 }
  0x10   : > { %p127_p6 = scmp.eq.s32.totalorder %s524_s2, 1  ;;  %p44_p7 = scmp.eq.s32.totalorder %s41_s27, 0 }
  0x11   : > { %p855_p8 = por %p60_p5, %p59_p3  ;;  %p133_p10 = scmp.eq.s32.totalorder %s525_s23, 1 }
  0x12   : > { %p859_p9 = por %p127_p6, %p53_p1  ;;  %p563_p13 = scmp.lt.s32.totalorder %s771_s22, 2 }
  0x13   : > { %s864_s30 = scalar_select %p44_p7, %s759_s19, %s46_s25  }
  0x14   : > { %s1047_s29 = scalar_select %p859_p9, 1, 0 }
  0x15   : > { %p866_p11 = por %p133_p10, %p59_p3  ;;  %s187_s6 = sand.u32 1, %s759_s19  }
  0x16   : > { %s528_s7 = sshll.u32 %s187_s6, 6  ;;  %s543_s8 = sshll.u32 %s767_s21, 10 }
  0x17   : > { %s1048_s5 = scalar_select %p866_p11, 1, 0 }
  0x18   : > { %s877_s11 = scalar_lea.hbm %s1039_s0, %s543_s8  ;;  %s191_s12 = scalar_lea.vmem [#allocation3], %s528_s7 }
  0x19   : > { %s200_s13 = sshll.u32 %s191_s12, 4  ;;  %p883_p0 = pnand %p563_p13, %p849_p4  ;;  %s879_s13 = int_to_ptr.vmem [resolvable:$true] %s200_s13 }
  0x1a   : > { %s888_s15 = scalar_lea.sflag [#allocation4], %s187_s6  ;;  %s627_s16 = scalar_lea.hbm %s877_s11, 1024 }
  0x1b   : > { %p628_p2 = scmp.ne.s32.totalorder %s877_s11, %s627_s16  ;;  %p629_p3 = pneg %p883_p0 }
  0x1c   : > { %s632_s25 = scalar_lea.hbm %s1039_s0, 2048  ;;  %p633_p4 = scmp.lt.u32.totalorder %s877_s11, %s1039_s0 }
  0x1d   : > { %p630_p5 = pnand %p629_p3, %p628_p2  ;;  %p634_p7 = scmp.lt.u32.totalorder %s632_s25, %s627_s16 }
  0x1e   : > { %p636_p13 = scmp.lt.u32.totalorder %s627_s16, %s877_s11 }
  0x1f   : > { %p631_p6 = pneg %p630_p5  ;;  %p635_p10 = por %p634_p7, %p633_p4 }
  0x21   : > { %p637_p12 = por %p636_p13, %p635_p10 }
  0x23   : > { %p638_p1 = pnand %p637_p12, %p631_p6 }
  0x25   : > { %641 = shalt.err (!%p638_p1)
}
  0x26   : > { %s642_s6 = scalar_lea.vmem %s879_s13, 1024  ;;  %s773_s7 = smov [#allocation3]  }
  0x27   : > { %p643_p2 = scmp.ne.s32.totalorder %s879_s13, %s642_s6  ;;  %s647_s8 = sshll.u32 %s773_s7, 4  ;;  %s648_s8 = int_to_ptr.vmem [resolvable:$false] %s647_s8 }
  0x28   : > { %s649_s9 = scalar_lea.vmem %s648_s8, 2048  ;;  %p650_p9 = scmp.lt.s32.totalorder %s879_s13, %s648_s8 }
  0x29   : > { %p645_p5 = pnand %p643_p2, %p629_p3  ;;  %p651_p4 = scmp.lt.s32.totalorder %s649_s9, %s642_s6 }
  0x2b   : > { %p646_p11 = pneg %p645_p5  ;;  %p652_p7 = por %p651_p4, %p650_p9 }
  0x2d   : > { %p653_p10 = pnand %p652_p7, %p646_p11 }
  0x2f   : > { %656 = shalt.err (!%p653_p10)
}
  0x30   : > { %s774_s10 = smov 256   ;;  %s775_s12 = smov 16  }
  0x31   : > { %555 = dma.hbm_to_vmem [thread:$0]  (!%p883_p0), %s877_s11, 1024, %s879_s13, %s888_s15, %s774_s10, %s774_s10, %s775_s12  }
  0x32   : > { %p208_p12 = scmp.lt.s32.totalorder %s771_s22, 3  ;;  %p1050_p1 = scmp.ge.s32.totalorder %s771_s22, 1 }
  0x34   : > { %p209_p3 = pnand %p1050_p1, %p208_p12 }
  0x35   : > { %s920_s16 = sand.u32 (!%p209_p3), 1, %s755_s18  }
  0x36   : > { %212 = sbr.rel (%p209_p3) target bundleno = 272 (0x110), region = 32  ;;  %s532_s2 = sshll.u32 (!%p209_p3), %s920_s16, 6 }
  0x37   : > { %s215_s23 = scalar_lea.sflag (!%p209_p3), [#allocation4], %s920_s16  ;;  %s218_s25 = scalar_lea.vmem (!%p209_p3), [#allocation3], %s532_s2 }
  0x3d   : > { %738 = dma.done.wait (%p855_p8), %s215_s23, 1024  }
  0x3e   : > { %740 = vsyncadd (%p855_p8), %s215_s23, 4294966272  ;;  %v776_v0 = vmov 0   ;;  %v261_v1 = vld [vmem:[%s1040_s1 + $0x10] sm:$0xff]  ;;  %v259_v2 = vld [vmem:[%s1040_s1] sm:$0xff]  ;;  %s309_s7 = sld [smem:[#allocation2]]  ;;  %v319_v39 = vlaneseq  ;;  %s533_s8 = sshll.u32 %s920_s16, 1 }
  0x3f   : > { %618 = vset.pattern.permute.xlu1 %v776_v0  ;;  %617 = vset.pattern.permute.xlu0 %v776_v0  ;;  %v262_v3 = vld [vmem:[%s1040_s1 + $0x18] sm:$0xff]  ;;  %v260_v4 = vld [vmem:[%s1040_s1 + $0x8] sm:$0xff]  ;;  %v251_v7 = vld [vmem:[%s218_s25] sm:$0xff]  ;;  %v777_v37 = vmov 1966171168   ;;  %s544_s9 = sshll.u32 %s763_s20, 5 }
  0x40   : > { %275 = vperm.xlu1 %618, %v261_v1   ;;  %265 = vperm.xlu0 %617, %v259_v2   ;;  %v252_v8 = vld [vmem:[%s218_s25 + $0x8] sm:$0xff]  ;;  %v253_v9 = vld [vmem:[%s218_s25 + $0x10] sm:$0xff]  ;;  %v254_v10 = vld [vmem:[%s218_s25 + $0x18] sm:$0xff]  ;;  %v317_v38 = vunpack.c.l.s4 %v777_v37  ;;  %v320_v45 = vshrl.u32 %v319_v39, 7  ;;  %s240_s10 = scalar_lea.vmem [#allocation6], %s533_s8  ;;  %vm944_vm0 = vcmp.lt.s32.totalorder %v319_v39, 256 }
  0x41   : > { %v255_v11 = vld [vmem:[%s218_s25 + $0x20] sm:$0xff]  ;;  %v256_v12 = vld [vmem:[%s218_s25 + $0x28] sm:$0xff]  ;;  %v257_v19 = vld [vmem:[%s218_s25 + $0x30] sm:$0xff]  ;;  %s389_s12 = sshll.u32 %s240_s10, 4  ;;  %s368_s11 = scalar_lea.sflag [#allocation5], %s920_s16  ;;  %s955_s12 = int_to_ptr.vmem [resolvable:$true] %s389_s12 }
  0x42   : > { %v258_v20 = vld [vmem:[%s218_s25 + $0x38] sm:$0xff]  ;;  %v318_v44 = vunpack.c.0.s8 %v317_v38  ;;  %s953_s25 = scalar_lea.hbm %s1042_s3, %s544_s9  ;;  %s657_s13 = scalar_lea.vmem %s955_s12, 32 }
  0x43   : > { %p658_p8 = scmp.ne.s32.totalorder %s955_s12, %s657_s13  ;;  %p1053_p9 = scmp.ne.s32.totalorder %s1047_s29, 0 }
  0x44   : > { %280 = vperm.xlu1 %618, %v262_v3   ;;  %270 = vperm.xlu0 %617, %v260_v4   ;;  %v310_v46 = vstv %s309_s7  ;;  %v321_v51 = vsub.s32 %v318_v44, %v320_v45  ;;  %s778_s14 = smov [#allocation6]  }
  0x45   : > { %p659_p11 = pnand %p658_p8, %p1053_p9  ;;  %s661_s15 = sshll.u32 %s778_s14, 4  ;;  %s662_s15 = int_to_ptr.vmem [resolvable:$false] %s661_s15 }
  0x46   : > { %s663_s26 = scalar_lea.vmem %s662_s15, 64  ;;  %p664_p6 = scmp.lt.s32.totalorder %s955_s12, %s662_s15 }
  0x47   : > { %p660_p0 = pneg %p659_p11  ;;  %p665_p13 = scmp.lt.s32.totalorder %s663_s26, %s657_s13 }
  0x49   : > { %p666_p2 = por %p665_p13, %p664_p6 }
  0x4b   : > { %p667_p5 = pnand %p666_p2, %p660_p0 }
  0xbf   : > { %v276_v5 = vpop.permute.xlu1 %275  ;;  %v266_v6 = vpop.permute.xlu0 %265 }
  0xc0   : > { %v283_v14 = vmul.f32 %v266_v6, %v251_v7  ;;  %v284_v15 = vmul.f32 %v266_v6, %v252_v8  ;;  %v287_v21 = vmul.f32 %v276_v5, %v255_v11  ;;  %v288_v22 = vmul.f32 %v276_v5, %v256_v12 }
  0xc3   : > { %v271_v13 = vpop.permute.xlu0 %270  ;;  %v281_v18 = vpop.permute.xlu1 %280 }
  0xc4   : > { %v285_v16 = vmul.f32 %v271_v13, %v253_v9  ;;  %v286_v17 = vmul.f32 %v271_v13, %v254_v10  ;;  %v289_v25 = vmul.f32 %v281_v18, %v257_v19  ;;  %v290_v26 = vmul.f32 %v281_v18, %v258_v20 }
  0xc6   : > { %v291_v23 = vadd.f32 %v285_v16, %v283_v14  ;;  %v300_v24 = vadd.f32 %v286_v17, %v284_v15 }
  0xc8   : > { %v292_v27 = vadd.f32 %v291_v23, %v287_v21  ;;  %v301_v28 = vadd.f32 %v300_v24, %v288_v22 }
  0xca   : > { %v293_v29 = vadd.f32 %v292_v27, %v289_v25  ;;  %v302_v30 = vadd.f32 %v301_v28, %v290_v26 }
  0xcc   : > { %v294_v31 = vrot.slane %v293_v29, 4  ;;  %v303_v32 = vrot.slane %v302_v30, 4 }
  0xce   : > { %v295_v33 = vadd.f32 %v294_v31, %v293_v29  ;;  %v304_v34 = vadd.f32 %v303_v32, %v302_v30 }
  0xd0   : > { %v296_v35 = vrot.slane %v295_v33, 2  ;;  %v305_v36 = vrot.slane %v304_v34, 2 }
  0xd2   : > { %v297_v40 = vadd.f32 %v296_v35, %v295_v33  ;;  %v306_v41 = vadd.f32 %v305_v36, %v304_v34 }
  0xd4   : > { %v298_v42 = vrot.slane %v297_v40, 1  ;;  %v307_v43 = vrot.slane %v306_v41, 1 }
  0xd6   : > { %v299_v47 = vadd.f32 %v298_v42, %v297_v40  ;;  %v308_v48 = vadd.f32 %v307_v43, %v306_v41 }
  0xd8   : > { %v311_v49 = vadd.f32 %v310_v46, %v299_v47  ;;  %v312_v50 = vadd.f32 %v310_v46, %v308_v48 }
  0xda   : > { %v315_v52 = vcombine.low %v311_v49, %v312_v50  ;;  %v336_v53 = vsub.f32 0.0, %v311_v49  ;;  %v337_v54 = vsub.f32 0.0, %v312_v50 }
  0xdc   : > { %v338_v55 = vmul.f32 1.442695, %v336_v53  ;;  %v340_v56 = vmul.f32 1.442695, %v337_v54  ;;  %v322_v57 = vrot.slane %v315_v52, %v321_v51 }
  0xde   : > { %619 = vpow2.f32 %v338_v55  ;;  %v329_v59 = vrot.slane %v322_v57, %v321_v51 }
  0xdf   : > { %621 = vpow2.f32 %v340_v56 }
  0xe0   : > { %335 = vst.msk [vmem:[%s240_s10] sm:$0x3] %vm944_vm0, %v329_v59 }
  0xe1   : > { %670 = shalt.err (!%p667_p5)
}
  0xe2   : > { %s671_s27 = scalar_lea.hbm %s953_s25, 32  ;;  %s675_s7 = scalar_lea.hbm %s1042_s3, 64 }
  0xe3   : > { %p672_p4 = scmp.ne.s32.totalorder %s953_s25, %s671_s27  ;;  %p676_p12 = scmp.lt.u32.totalorder %s953_s25, %s1042_s3 }
  0xe4   : > { %p677_p1 = scmp.lt.u32.totalorder %s675_s7, %s671_s27  ;;  %p679_p8 = scmp.lt.u32.totalorder %s671_s27, %s953_s25 }
  0xe5   : > { %p673_p7 = pnand %p672_p4, %p1053_p9 }
  0xe6   : > { %p678_p3 = por %p677_p1, %p676_p12 }
  0xe7   : > { %p674_p10 = pneg %p673_p7 }
  0xe8   : > { %p680_p11 = por %p679_p8, %p678_p3 }
  0xea   : > { %p681_p0 = pnand %p680_p11, %p674_p10 }
  0xec   : > { %684 = shalt.err (!%p681_p0)
}
  0xed   : > { %548 = dma.vmem_to_hbm [thread:$0]  (%p1053_p9), %s955_s12, 32, %s953_s25, %s368_s11   ;;  %v620_v60 = vpop.eup %619 }
  0xee   : > { %v622_v61 = vpop.eup %621  ;;  %v342_v62 = vadd.f32 1.0, %v620_v60  ;;  %s247_s23 = scalar_lea.vmem [#allocation7], %s533_s8  ;;  %s988_s12 = scalar_lea.hbm %s1043_s4, %s544_s9 }
  0xef   : > { %v343_v63 = vadd.f32 1.0, %v622_v61  ;;  %s405_s13 = sshll.u32 %s247_s23, 4  ;;  %s373_s25 = scalar_lea.sflag [#allocation8], %s920_s16  ;;  %s990_s13 = int_to_ptr.vmem [resolvable:$true] %s405_s13 }
  0xf0   : > { %623 = vrcp.f32 %v342_v62  ;;  %s685_s11 = scalar_lea.vmem %s990_s13, 32  ;;  %s779_s20 = smov [#allocation7]  }
  0xf1   : > { %625 = vrcp.f32 %v343_v63  ;;  %p686_p6 = scmp.ne.s32.totalorder %s990_s13, %s685_s11  ;;  %s689_s8 = sshll.u32 %s779_s20, 4  ;;  %s690_s8 = int_to_ptr.vmem [resolvable:$false] %s689_s8 }
  0xf2   : > { %s691_s26 = scalar_lea.vmem %s690_s8, 64  ;;  %p692_p5 = scmp.lt.s32.totalorder %s990_s13, %s690_s8 }
  0xf3   : > { %p687_p13 = pnand %p686_p6, %p1053_p9  ;;  %p693_p4 = scmp.lt.s32.totalorder %s691_s26, %s685_s11 }
  0xf5   : > { %p688_p2 = pneg %p687_p13  ;;  %p694_p7 = por %p693_p4, %p692_p5 }
  0xf7   : > { %p695_p10 = pnand %p694_p7, %p688_p2 }
  0xfa   : > { %v624_v0 = vpop.eup %623 }
  0xfb   : > { %v626_v1 = vpop.eup %625 }
  0xfc   : > { %v350_v2 = vcombine.low %v624_v0, %v626_v1 }
  0xfe   : > { %v357_v3 = vrot.slane %v350_v2, %v321_v51 }
 0x100   : > { %v364_v4 = vrot.slane %v357_v3, %v321_v51 }
 0x102   : > { %366 = vst.msk [vmem:[%s247_s23] sm:$0x3] %vm944_vm0, %v364_v4 }
 0x103   : > { %698 = shalt.err (!%p695_p10)
}
 0x104   : > { %s699_s16 = scalar_lea.hbm %s988_s12, 32  ;;  %s703_s6 = scalar_lea.hbm %s1043_s4, 64 }
 0x105   : > { %p700_p12 = scmp.ne.s32.totalorder %s988_s12, %s699_s16  ;;  %p704_p8 = scmp.lt.u32.totalorder %s988_s12, %s1043_s4 }
 0x106   : > { %p705_p11 = scmp.lt.u32.totalorder %s703_s6, %s699_s16  ;;  %p707_p6 = scmp.lt.u32.totalorder %s699_s16, %s988_s12 }
 0x107   : > { %p701_p1 = pnand %p700_p12, %p1053_p9 }
 0x108   : > { %p706_p0 = por %p705_p11, %p704_p8 }
 0x109   : > { %p702_p3 = pneg %p701_p1 }
 0x10a   : > { %p708_p13 = por %p707_p6, %p706_p0 }
 0x10c   : > { %p709_p2 = pnand %p708_p13, %p702_p3 }
 0x10e   : > { %712 = shalt.err (!%p709_p2)
}
 0x10f   : > { %549 = dma.vmem_to_hbm [thread:$0]  (%p1053_p9), %s990_s13, 32, %s988_s12, %s373_s25  }
 0x110 PF: > { %s417_s10 = sand.u32 1, %s751_s17   ;;  %p1054_p5 = scmp.ne.s32.totalorder %s1048_s5, 0 }
 0x111   : > { %p1055_p4 = scmp.ge.s32.totalorder %s771_s22, 2  ;;  %s418_s2 = scalar_lea.sflag [#allocation5], %s417_s10 }
 0x113   : > { %p557_p7 = pnand %p1055_p4, %p1054_p5 }
 0x115   : > { %742 = dma.done.wait (!%p557_p7), %s418_s2, 32  }
 0x116   : > { %744 = vsyncadd (!%p557_p7), %s418_s2, 4294967264  ;;  %s427_s23 = scalar_lea.sflag [#allocation8], %s417_s10 }
 0x117   : > { %746 = dma.done.wait (!%p557_p7), %s427_s23, 32  }
 0x118   : > { %748 = vsyncadd (!%p557_p7), %s427_s23, 4294967264  ;;  %s25_s22 = sadd.s32 1, %s771_s22   ;;  %s1056_s17 = smov %s755_s18 }
 0x119   : > { %p22_p10 = scmp.ge.s32.totalorder %s25_s22, 4   ;;  %s1057_s18 = smov %s759_s19 }
 0x11a   : > { %s1058_s19 = smov %s864_s30  ;;  %s1059_s20 = smov %s767_s21 }
 0x11b   : > { %s1060_s21 = smov %s1062_s24  ;;  %24 = sbr.rel (!%p22_p10) target bundleno = 10 (0xa), region = 94 }
 0x122   :  { %432 = vsyncpa [#allocation4], 1 }
 0x123   :  { %434 = vsyncpa [#allocation4 + $0x1], 1 }
 0x124   :  { %435 = vsyncpa [#allocation5], 1 }
 0x125   :  { %437 = vsyncpa [#allocation5 + $0x1], 1 }
 0x126   :  { %438 = vsyncpa [#allocation8], 1 }
 0x127   :  { %440 = vsyncpa [#allocation8 + $0x1], 1 }

</bundles_post_ra>
